<compile_context>
chip_gen: v5e
topology: v5e:2x2
jax: 0.10.0
libtpu: 0.0.40
codegen_flags: <defaults>
</compile_context>

<pallas_src>
import jax
import jax.numpy as jnp
from jax import lax
from jax.experimental import pallas as pl
from jax.experimental.pallas import tpu as pltpu


# ----------------------------------------------------------------------------
# Helpers
# ----------------------------------------------------------------------------

def _pick_tile(size, target, align):
    """Largest tile <= target that is a multiple of `align` and divides `size`;
    falls back to the full dimension (full-extent blocks are always legal)."""
    if size <= target:
        return size
    t = (target // align) * align
    while t >= align:
        if size % t == 0:
            return t
        t -= align
    return size


def _pad_len(n):
    """Pad the token count to a sublane/lane friendly length (multiple of 8 below 64, else 128)."""
    if n <= 64:
        return ((n + 7) // 8) * 8
    return ((n + 127) // 128) * 128


def _gelu(y):
    # exact (erf-based) GELU, matching torch.nn.GELU default
    return 0.5 * y * (1.0 + lax.erf(y * (2.0 ** -0.5)))


# ----------------------------------------------------------------------------
# Pallas kernels
# ----------------------------------------------------------------------------

def _matmul(x, w, b=None, activation=None, residual=None, tm=256, tn=512, tk=2048):
    """y = x @ w (+ b) (+ GELU) (+ residual).  bf16 MXU operands, f32 accumulation/output."""
    M, K = x.shape
    _, N = w.shape
    tm = _pick_tile(M, tm, 16)
    tn = _pick_tile(N, tn, 128)
    tk = _pick_tile(K, tk, 128)
    nk = K // tk
    has_b = b is not None
    has_r = residual is not None

    def _epilogue(y, b_ref, r_ref, o_ref):
        if has_b:
            y = y + b_ref[...]
        if activation == "gelu":
            y = _gelu(y)
        if has_r:
            y = y + r_ref[...]
        o_ref[...] = y.astype(o_ref.dtype)

    inputs = [x if x.dtype == jnp.bfloat16 else x.astype(jnp.bfloat16),
              w.astype(jnp.bfloat16)]

    if nk == 1:
        # Full contraction depth in one MXU pass: no accumulator scratch, no output revisit.
        def kernel(*refs):
            x_ref, w_ref = refs[0], refs[1]
            idx = 2
            b_ref = None
            if has_b:
                b_ref = refs[idx]; idx += 1
            r_ref = None
            if has_r:
                r_ref = refs[idx]; idx += 1
            o_ref = refs[idx]
            y = jnp.dot(x_ref[...], w_ref[...], preferred_element_type=jnp.float32)
            _epilogue(y, b_ref, r_ref, o_ref)

        in_specs = [pl.BlockSpec((tm, tk), lambda i, j: (i, 0)),
                    pl.BlockSpec((tk, tn), lambda i, j: (0, j))]
        if has_b:
            in_specs.append(pl.BlockSpec((1, tn), lambda i, j: (0, j)))
            inputs.append(b.reshape(1, N).astype(jnp.float32))
        if has_r:
            in_specs.append(pl.BlockSpec((tm, tn), lambda i, j: (i, j)))
            inputs.append(residual.astype(jnp.float32))
        return pl.pallas_call(
            kernel,
            out_shape=jax.ShapeDtypeStruct((M, N), jnp.float32),
            grid=(M // tm, N // tn),
            in_specs=in_specs,
            out_specs=pl.BlockSpec((tm, tn), lambda i, j: (i, j)),
            compiler_params=pltpu.CompilerParams(
                dimension_semantics=("parallel", "parallel")),
        )(*inputs)

    # K-tiled path with f32 VMEM accumulator (used for large K, e.g. the patch embedding).
    def kernel(*refs):
        x_ref, w_ref = refs[0], refs[1]
        idx = 2
        b_ref = None
        if has_b:
            b_ref = refs[idx]; idx += 1
        r_ref = None
        if has_r:
            r_ref = refs[idx]; idx += 1
        o_ref, acc_ref = refs[idx], refs[idx + 1]
        kk = pl.program_id(2)

        @pl.when(kk == 0)
        def _init():
            acc_ref[...] = jnp.zeros_like(acc_ref)

        acc_ref[...] += jnp.dot(x_ref[...], w_ref[...],
                                preferred_element_type=jnp.float32)

        @pl.when(kk == nk - 1)
        def _fin():
            _epilogue(acc_ref[...], b_ref, r_ref, o_ref)

    in_specs = [pl.BlockSpec((tm, tk), lambda i, j, k: (i, k)),
                pl.BlockSpec((tk, tn), lambda i, j, k: (k, j))]
    if has_b:
        in_specs.append(pl.BlockSpec((1, tn), lambda i, j, k: (0, j)))
        inputs.append(b.reshape(1, N).astype(jnp.float32))
    if has_r:
        in_specs.append(pl.BlockSpec((tm, tn), lambda i, j, k: (i, j)))
        inputs.append(residual.astype(jnp.float32))

    return pl.pallas_call(
        kernel,
        out_shape=jax.ShapeDtypeStruct((M, N), jnp.float32),
        grid=(M // tm, N // tn, nk),
        in_specs=in_specs,
        out_specs=pl.BlockSpec((tm, tn), lambda i, j, k: (i, j)),
        scratch_shapes=[pltpu.VMEM((tm, tn), jnp.float32)],
        compiler_params=pltpu.CompilerParams(
            dimension_semantics=("parallel", "parallel", "arbitrary")),
    )(*inputs)


def _ln_matmul(x, gamma, beta, w, b=None, activation=None, out_dtype=jnp.float32,
               eps=1e-5, tm=256, tn=512):
    """y = LayerNorm(x) @ w (+ b) (+ GELU).

    The LN over the (tm, K) row tile is computed ONCE (f32, full K) into a bf16 VMEM scratch
    under @pl.when(j == 0) and reused for every output column tile j (j axis is "arbitrary"
    so each core sees j = 0 first for every row tile it owns)."""
    M, K = x.shape
    _, N = w.shape
    tm = _pick_tile(M, tm, 16)
    tn = _pick_tile(N, tn, 128)
    has_b = b is not None

    def kernel(*refs):
        x_ref, g_ref, bt_ref, w_ref = refs[:4]
        idx = 4
        b_ref = None
        if has_b:
            b_ref = refs[idx]; idx += 1
        o_ref = refs[idx]
        xn_scr = refs[idx + 1]

        @pl.when(pl.program_id(1) == 0)
        def _ln():
            xv = x_ref[...]
            mu = jnp.mean(xv, axis=-1, keepdims=True)
            var = jnp.mean(jnp.square(xv - mu), axis=-1, keepdims=True)
            xn = (xv - mu) * lax.rsqrt(var + eps) * g_ref[...] + bt_ref[...]
            xn_scr[...] = xn.astype(jnp.bfloat16)

        y = jnp.dot(xn_scr[...], w_ref[...], preferred_element_type=jnp.float32)
        if has_b:
            y = y + b_ref[...]
        if activation == "gelu":
            y = _gelu(y)
        o_ref[...] = y.astype(o_ref.dtype)

    in_specs = [pl.BlockSpec((tm, K), lambda i, j: (i, 0)),
                pl.BlockSpec((1, K), lambda i, j: (0, 0)),
                pl.BlockSpec((1, K), lambda i, j: (0, 0)),
                pl.BlockSpec((K, tn), lambda i, j: (0, j))]
    inputs = [x.astype(jnp.float32),
              gamma.reshape(1, K).astype(jnp.float32),
              beta.reshape(1, K).astype(jnp.float32),
              w.astype(jnp.bfloat16)]
    if has_b:
        in_specs.append(pl.BlockSpec((1, tn), lambda i, j: (0, j)))
        inputs.append(b.reshape(1, N).astype(jnp.float32))

    return pl.pallas_call(
        kernel,
        out_shape=jax.ShapeDtypeStruct((M, N), out_dtype),
        grid=(M // tm, N // tn),
        in_specs=in_specs,
        out_specs=pl.BlockSpec((tm, tn), lambda i, j: (i, j)),
        scratch_shapes=[pltpu.VMEM((tm, K), jnp.bfloat16)],
        compiler_params=pltpu.CompilerParams(
            # j must be "arbitrary": the LN scratch computed at j == 0 is reused for all j.
            dimension_semantics=("parallel", "arbitrary")),
    )(*inputs)


def _reattention(qkv, reattn_w, ln_g, ln_b, heads, dim_head, scale, n_valid,
                 eps=1e-5, tq=128):
    """DeepViT re-attention on a padded token axis.

    qkv: (B, Npad, 3*H*Dh) bf16 slab from the fused LN->QKV matmul ([q|k|v], heads packed h*Dh).
    Tokens >= n_valid are padding: they are masked out of the softmax (keys) and zeroed in V.
    Returns (B, Npad, H*Dh) bf16 -- the layout the output projection consumes (no transposes).
    Grid = (B, Npad // tq); each step computes all H heads for a tq-row query tile.
    """
    B, Npad, three_inner = qkv.shape
    H, Dh = heads, dim_head
    inner = H * Dh
    assert three_inner == 3 * inner
    tq = _pick_tile(Npad, tq, 8)
    nq = Npad // tq
    ph = 2 if H % 2 == 0 else 1          # head-pair (128-lane) q/k/v slices & output stores
    pad = Npad > n_valid
    neg = -1e30

    # vreg-sized mixing blocks: all H input sub-blocks stay live in registers per block.
    br = 8
    bc = min(Npad, 128)
    nrb, ncb = tq // br, Npad // bc
    inv_h = 1.0 / H

    def kernel(q_ref, k_ref, v_ref, w_ref, g_ref, b_ref, o_ref,
               attn_scr, re_scr, mean_scr, inv_scr):
        if pad:
            kmask = lax.broadcasted_iota(jnp.int32, (tq, Npad), 1) < n_valid

        # 1) per-head masked softmax((q*scale) k^T) -> attn_scr (H, tq, Npad);
        #    q/k loaded one 2*Dh (=128-lane) head pair at a time.
        for p0 in range(0, H, ph):
            qp = q_ref[0, :, p0 * Dh:(p0 + ph) * Dh] * scale        # bf16 (tq, ph*Dh)
            kp = k_ref[0, :, p0 * Dh:(p0 + ph) * Dh]                # bf16 (Npad, ph*Dh)
            for t in range(ph):
                h = p0 + t
                s = lax.dot_general(qp[:, t * Dh:(t + 1) * Dh],
                                    kp[:, t * Dh:(t + 1) * Dh],
                                    (((1,), (1,)), ((), ())),
                                    preferred_element_type=jnp.float32)   # (tq, Npad)
                if pad:
                    s = jnp.where(kmask, s, neg)
                s = s - jnp.max(s, axis=-1, keepdims=True)
                e = jnp.exp(s)
                attn_scr[h] = e * pl.reciprocal(jnp.sum(e, axis=-1, keepdims=True))

        # 2) head mixing reattn[g] = sum_h attn[h] * W[h, g]  ('b h i j, h g -> b g i j'),
        #    blocked over (br, bc) vreg tiles driven by a fori_loop over row blocks:
        #    each attn[h] sub-block is read from VMEM once (not H times) and the per-position
        #    mean / rsqrt(var) of the head-axis LayerNorm are produced on the fly.
        def mix_rows(rb, carry):
            r0 = pl.multiple_of(rb * br, br)
            for cb in range(ncb):                      # static lane-dim column blocks
                c0 = cb * bc
                a = [attn_scr[h, pl.ds(r0, br), c0:c0 + bc] for h in range(H)]
                s1 = jnp.zeros((br, bc), jnp.float32)
                s2 = jnp.zeros((br, bc), jnp.float32)
                for g in range(H):
                    r = a[0] * w_ref[0, g]
                    for h in range(1, H):
                        r = r + a[h] * w_ref[h, g]
                    re_scr[g, pl.ds(r0, br), c0:c0 + bc] = r
                    s1 = s1 + r
                    s2 = s2 + r * r
                mean = s1 * inv_h
                var = jnp.maximum(s2 * inv_h - mean * mean, 0.0)
                mean_scr[pl.ds(r0, br), c0:c0 + bc] = mean
                inv_scr[pl.ds(r0, br), c0:c0 + bc] = lax.rsqrt(var + eps)
            return carry

        lax.fori_loop(0, nrb, mix_rows, 0)

        # 3) LayerNorm across heads, aggregate with V (bf16 MXU), head-pair dense stores.
        for p0 in range(0, H, ph):
            vp = v_ref[0, :, p0 * Dh:(p0 + ph) * Dh]                # bf16 (Npad, ph*Dh)
            if pad:
                vmask = lax.broadcasted_iota(jnp.int32, (Npad, ph * Dh), 0) < n_valid
                vp = jnp.where(vmask, vp, jnp.zeros_like(vp))       # drop padded tokens
            outs = []
            for t in range(ph):
                g = p0 + t
                norm = (re_scr[g] - mean_scr[...]) * inv_scr[...] * g_ref[g] + b_ref[g]
                og = jnp.dot(norm.astype(jnp.bfloat16), vp[:, t * Dh:(t + 1) * Dh],
                             preferred_element_type=jnp.float32)     # (tq, Dh)
                outs.append(og)
            o_ref[0, :, p0 * Dh:(p0 + ph) * Dh] = (
                jnp.concatenate(outs, axis=-1).astype(o_ref.dtype))

    q_spec = pl.BlockSpec((1, tq, inner), lambda bi, qi: (bi, qi, 0))
    k_spec = pl.BlockSpec((1, Npad, inner), lambda bi, qi: (bi, 0, 1))
    v_spec = pl.BlockSpec((1, Npad, inner), lambda bi, qi: (bi, 0, 2))
    smem = pl.BlockSpec(memory_space=pltpu.MemorySpace.SMEM)

    # VMEM budget from the real footprint (scratches + double-buffered inputs/outputs).
    qkv_item = jnp.dtype(qkv.dtype).itemsize
    fp = (2 * H * tq * Npad * 4                 # attn_scr + re_scr
          + 2 * tq * Npad * 4                   # mean_scr + inv_scr
          + 2 * tq * inner * qkv_item           # q tile (double-buffered)
          + 2 * 2 * Npad * inner * qkv_item     # k + v slabs (double-buffered)
          + 2 * tq * inner * 2)                 # bf16 output tile (double-buffered)
    vmem_limit = int(min(max(1.4 * fp + (4 << 20), 16 << 20), 64 << 20))

    return pl.pallas_call(
        kernel,
        out_shape=jax.ShapeDtypeStruct((B, Npad, inner), jnp.bfloat16),
        grid=(B, nq),
        in_specs=[q_spec, k_spec, v_spec, smem, smem, smem],
        out_specs=pl.BlockSpec((1, tq, inner), lambda bi, qi: (bi, qi, 0)),
        scratch_shapes=[pltpu.VMEM((H, tq, Npad), jnp.float32),
                        pltpu.VMEM((H, tq, Npad), jnp.float32),
                        pltpu.VMEM((tq, Npad), jnp.float32),
                        pltpu.VMEM((tq, Npad), jnp.float32)],
        compiler_params=pltpu.CompilerParams(
            dimension_semantics=("parallel", "parallel"),
            vmem_limit_bytes=vmem_limit),
    )(qkv, qkv, qkv,
      reattn_w.astype(jnp.float32), ln_g.astype(jnp.float32), ln_b.astype(jnp.float32))


# ----------------------------------------------------------------------------
# DeepViT forward (thin JAX glue, all hot math in the kernels above)
# ----------------------------------------------------------------------------

def _attention_block(lp, x, heads, dim_head, n_valid):
    B, Np, D = x.shape
    inner = heads * dim_head
    x2 = x.reshape(B * Np, D)
    # fused LN1 -> QKV projection (no bias); bf16 output (MXU-only consumer)
    qkv = _ln_matmul(x2, lp["ln1_g"], lp["ln1_b"], lp["qkv_w"], None,
                     out_dtype=jnp.bfloat16)
    qkv = qkv.reshape(B, Np, 3 * inner)
    attn = _reattention(qkv, lp["reattn_w"], lp["reattn_ln_g"], lp["reattn_ln_b"],
                        heads, dim_head, scale=dim_head ** -0.5, n_valid=n_valid)
    # output projection with fused bias + residual add (residual stream stays f32)
    out = _matmul(attn.reshape(B * Np, inner), lp["out_w"], lp["out_b"], residual=x2)
    return out.reshape(B, Np, D)


def _ff_block(lp, x):
    B, Np, D = x.shape
    x2 = x.reshape(B * Np, D)
    h = _ln_matmul(x2, lp["ln2_g"], lp["ln2_b"], lp["ff1_w"], lp["ff1_b"],
                   activation="gelu", out_dtype=jnp.bfloat16)
    out = _matmul(h, lp["ff2_w"], lp["ff2_b"], residual=x2)
    return out.reshape(B, Np, D)


def deepvit_forward(params, cfg, img):
    B, C, Himg, Wimg = img.shape
    p = cfg["patch_size"]
    assert Himg % p == 0 and Wimg % p == 0

    # 'b c (h p1) (w p2) -> b (h w) (p1 p2 c)'
    x = img.reshape(B, C, Himg // p, p, Wimg // p, p)
    x = jnp.transpose(x, (0, 2, 4, 3, 5, 1))
    n_patch = (Himg // p) * (Wimg // p)
    x = x.reshape(B, n_patch, p * p * C)

    # patch embedding
    x = _matmul(x.reshape(B * n_patch, -1), params["patch_w"], params["patch_b"])
    x = x.reshape(B, n_patch, cfg["dim"])

    # cls token + positional embedding   (TODO(synk): emb_dropout / dropout == identity, eval mode)
    cls = jnp.broadcast_to(params["cls"], (B, 1, cfg["dim"]))
    x = jnp.concatenate([cls, x], axis=1)
    x = x + params["pos"][:, : n_patch + 1]

    # pad tokens to a sublane/lane friendly length; padded keys are masked inside attention
    n_tok = n_patch + 1
    n_pad = _pad_len(n_tok)
    if n_pad > n_tok:
        x = jnp.pad(x, ((0, 0), (0, n_pad - n_tok), (0, 0)))

    # transformer (residual adds are fused into the dense epilogues)
    for lp in params["layers"]:
        x = _attention_block(lp, x, cfg["heads"], cfg["dim_head"], n_valid=n_tok)
        x = _ff_block(lp, x)

    # pool = 'cls', then LayerNorm + mlp_head.  (B, latent_dim+1) is a degenerate sub-128-lane
    # tile -> plain XLA per perf review instead of a masked-store Pallas kernel.
    x_cls = x[:, 0]
    mu = jnp.mean(x_cls, axis=-1, keepdims=True)
    var = jnp.mean(jnp.square(x_cls - mu), axis=-1, keepdims=True)
    xn = (x_cls - mu) * lax.rsqrt(var + 1e-5) * params["head_ln_g"] + params["head_ln_b"]
    return xn @ params["head_w"] + params["head_b"]


def vit_shift_predictor(params, cfg, x1, x2):
    img = jnp.concatenate([x1, x2], axis=1)                            # torch.cat([x1, x2], 1)
    out = deepvit_forward(params, cfg, img)
    logits = out[:, : cfg["latent_dim"]]
    shift = jnp.squeeze(out[:, -1])
    return logits, shift


# ----------------------------------------------------------------------------
# Deterministic synthetic parameter init (shapes follow DeepViT's __init__)
# ----------------------------------------------------------------------------

def init_params(key, *, image_size, patch_size, channels, latent_dim,
                dim, depth, heads, dim_head, mlp_dim):
    num_patches = (image_size // patch_size) ** 2
    patch_dim = channels * patch_size ** 2
    inner = heads * dim_head
    num_classes = latent_dim + 1

    keys = list(jax.random.split(key, 128))

    def nrm(shape, scale=0.02):
        return (scale * jax.random.normal(keys.pop(), shape)).astype(jnp.float32)

    params = {
        "patch_w": nrm((patch_dim, dim)),
        "patch_b": jnp.zeros((dim,), jnp.float32),
        "cls": nrm((1, 1, dim)),
        "pos": nrm((1, num_patches + 1, dim)),
        "head_ln_g": jnp.ones((dim,), jnp.float32),
        "head_ln_b": jnp.zeros((dim,), jnp.float32),
        "head_w": nrm((dim, num_classes)),
        "head_b": jnp.zeros((num_classes,), jnp.float32),
        "layers": [],
    }
    for _ in range(depth):
        params["layers"].append({
            "ln1_g": jnp.ones((dim,), jnp.float32),
            "ln1_b": jnp.zeros((dim,), jnp.float32),
            "qkv_w": nrm((dim, 3 * inner)),
            "reattn_w": nrm((heads, heads), scale=1.0),
            "reattn_ln_g": jnp.ones((heads,), jnp.float32),
            "reattn_ln_b": jnp.zeros((heads,), jnp.float32),
            "out_w": nrm((inner, dim)),
            "out_b": jnp.zeros((dim,), jnp.float32),
            "ln2_g": jnp.ones((dim,), jnp.float32),
            "ln2_b": jnp.zeros((dim,), jnp.float32),
            "ff1_w": nrm((dim, mlp_dim)),
            "ff1_b": jnp.zeros((mlp_dim,), jnp.float32),
            "ff2_w": nrm((mlp_dim, dim)),
            "ff2_b": jnp.zeros((dim,), jnp.float32),
        })
    return params


# ----------------------------------------------------------------------------
# Demo (scaled-down sizes; real module uses dim=1024, depth=6, heads=16, patch_size=32)
# ----------------------------------------------------------------------------

if __name__ == "__main__":
    B = 2
    cfg = dict(
        image_size=16,     # real: arbitrary, patch_size=32
        patch_size=8,
        channels=6,        # cat([x1, x2], dim=1) with 3 channels each
        latent_dim=8,      # self.dim in ViTShiftPredictor; num_classes = latent_dim + 1
        dim=128,           # real: 1024
        depth=2,           # real: 6
        heads=2,           # real: 16
        dim_head=64,       # DeepViT default (head pairs give 128-lane dense loads/stores)
        mlp_dim=256,       # real: 2048
    )

    root = jax.random.PRNGKey(0)
    k_param, k_x1, k_x2 = jax.random.split(root, 3)

    params = init_params(k_param, **cfg)
    x1 = jax.random.normal(k_x1, (B, 3, cfg["image_size"], cfg["image_size"]), jnp.float32)
    x2 = jax.random.normal(k_x2, (B, 3, cfg["image_size"], cfg["image_size"]), jnp.float32)

    logits, shift = vit_shift_predictor(params, cfg, x1, x2)
    jax.block_until_ready((logits, shift))

    assert logits.shape == (B, cfg["latent_dim"]), logits.shape
    assert shift.shape == (B,), shift.shape
    assert jnp.all(jnp.isfinite(logits)) and jnp.all(jnp.isfinite(shift))
    print("KERNEL_OK")
</pallas_src>

<mosaic_0001>
module attributes {stable_mosaic.version = 11 : i64} {
  func.func @kernel(%arg0: i32, %arg1: i32, %arg2: memref<8x384xbf16, #tpu.memory_space<vmem>>, %arg3: memref<384x128xbf16, #tpu.memory_space<vmem>>, %arg4: memref<1x128xf32, #tpu.memory_space<vmem>>, %arg5: memref<8x128xf32, #tpu.memory_space<vmem>>) attributes {dimension_semantics = [#tpu.dimension_semantics<parallel>, #tpu.dimension_semantics<parallel>], iteration_bounds = array<i64: 1, 1>, scalar_prefetch = 0 : i64, scratch_operands = 0 : i64, tpu.core_type = #tpu.core_type<tc>, window_params = [{transform_indices = @transform_0, window_bounds = array<i64: 8, 384>}, {transform_indices = @transform_1, window_bounds = array<i64: 384, 128>}, {transform_indices = @transform_2, window_bounds = array<i64: 1, 128>}, {transform_indices = @transform_3, window_bounds = array<i64: 8, 128>}]} {
    %c0 = arith.constant 0 : index
    %c0_0 = arith.constant 0 : index
    %0 = vector.load %arg2[%c0, %c0_0] : memref<8x384xbf16, #tpu.memory_space<vmem>>, vector<8x384xbf16>
    %c0_1 = arith.constant 0 : index
    %c0_2 = arith.constant 0 : index
    %1 = vector.load %arg3[%c0_1, %c0_2] : memref<384x128xbf16, #tpu.memory_space<vmem>>, vector<384x128xbf16>
    %cst = arith.constant dense<0.000000e+00> : vector<8x128xf32>
    %2 = tpu.matmul %0, %1, %cst {dimension_numbers = #tpu.dot_dimension_numbers<[1], [0], [0], [1], [0, 0, 1, 1], [], []>} : vector<8x384xbf16>, vector<384x128xbf16>, vector<8x128xf32> -> vector<8x128xf32>
    %c0_3 = arith.constant 0 : index
    %c0_4 = arith.constant 0 : index
    %3 = vector.load %arg4[%c0_3, %c0_4] : memref<1x128xf32, #tpu.memory_space<vmem>>, vector<1x128xf32>
    %4 = vector.broadcast %3 : vector<1x128xf32> to vector<8x128xf32>
    %5 = arith.addf %2, %4 : vector<8x128xf32>
    %c0_5 = arith.constant 0 : index
    %c0_6 = arith.constant 0 : index
    %6 = vector.load %arg5[%c0_5, %c0_6] : memref<8x128xf32, #tpu.memory_space<vmem>>, vector<8x128xf32>
    tpu.vector_store %arg5[%c0_5, %c0_6], %5 {strides = array<i32>} : memref<8x128xf32, #tpu.memory_space<vmem>>, vector<8x128xf32>,
    return
  }
  func.func @transform_0(%arg0: i32, %arg1: i32) -> (i32, i32) {
    %c0_i32 = arith.constant 0 : i32
    %c0_i32_0 = arith.constant 0 : i32
    return %arg0, %c0_i32 : i32, i32
  }
  func.func @transform_1(%arg0: i32, %arg1: i32) -> (i32, i32) {
    %c0_i32 = arith.constant 0 : i32
    %c0_i32_0 = arith.constant 0 : i32
    return %c0_i32, %arg1 : i32, i32
  }
  func.func @transform_2(%arg0: i32, %arg1: i32) -> (i32, i32) {
    %c0_i32 = arith.constant 0 : i32
    %c0_i32_0 = arith.constant 0 : i32
    return %c0_i32, %arg1 : i32, i32
  }
  func.func @transform_3(%arg0: i32, %arg1: i32) -> (i32, i32) {
    %c0_i32 = arith.constant 0 : i32
    return %arg0, %arg1 : i32, i32
  }
}

</mosaic_0001>

<bundles_post_ra>
// kernel: tpu_custom_call.1
= control target key start
LH: loop header
LB: loop body
LE: loop exit
PB: predicated region body
PF: predicated region fallthrough
CT: control target
= control target key end

     0   :  { %8 = vsyncpa [#allocation3], 0  ;;  %s553_s0 = inlined_call_operand.hbm [shape: bf16[8,384], index: 0, kind: input, shape index: {}]   ;;  %s554_s1 = inlined_call_operand.hbm [shape: bf16[384,128], index: 1, kind: input, shape index: {}]   ;;  %s555_s2 = inlined_call_operand.vmem [shape: f32[1,128], index: 2, kind: input, shape index: {}]   ;;  %s556_s3 = inlined_call_operand.hbm [shape: f32[8,128], index: 3, kind: output, shape index: {}]  }
   0x1   :  { %9 = vsyncpa [#allocation6], 0 }
   0x2   :  { %10 = vsyncpa [#allocation4], 0  ;;  %s16_s14 = sshll.u32 %s553_s0, 4  ;;  %s516_s15 = smov [#allocation2]   ;;  %s17_s14 = int_to_ptr.hbm [resolvable:$true] %s16_s14 }
   0x3   :  { %s18_s16 = sshll.u32 %s516_s15, 4  ;;  %s26_s19 = sshll.u32 %s554_s1, 4  ;;  %s19_s16 = int_to_ptr.vmem [resolvable:$true] %s18_s16  ;;  %s27_s19 = int_to_ptr.hbm [resolvable:$true] %s26_s19 }
   0x4   :  { %21 = dma.hbm_to_vmem [thread:$0]  %s17_s14, 192, %s19_s16, [#allocation3]  }
   0x5   :  { %s517_s20 = smov [#allocation5]   ;;  %s518_s22 = smov 64  }
   0x6   :  { %s28_s21 = sshll.u32 %s517_s20, 4  ;;  %s519_s23 = smov 4   ;;  %s29_s21 = int_to_ptr.vmem [resolvable:$true] %s28_s21 }
   0x7   :  { %34 = dma.hbm_to_vmem [thread:$0]  %s27_s19, 3072, %s29_s21, [#allocation6], %s518_s22, %s518_s22, %s519_s23  }
   0x8   :  { %510 = dma.done.wait [#allocation3], 192  }
   0x9   :  { %511 = vsyncadd [#allocation3], 4294967104 }
   0xa   :  { %512 = dma.done.wait [#allocation6], 3072  }
   0xb   :  { %513 = vsyncadd [#allocation6], 4294964224  ;;  %v415_v0 = vld [vmem:[#allocation5 + $0x38] sm:$0xff]  ;;  %v414_v3 = vld [vmem:[#allocation5 + $0x30] sm:$0xff]  ;;  %s520_s24 = smov [#allocation7]   ;;  %s301_s28 = sshll.u32 %s556_s3, 4  ;;  %s302_s28 = int_to_ptr.hbm [resolvable:$true] %s301_s28 }
   0xc   :  { %v423_v1 = vld [vmem:[#allocation5 + $0x78] sm:$0xff]  ;;  %254 = vmatpush.bf16.msra.mxu0 %v415_v0  ;;  %v422_v4 = vld [vmem:[#allocation5 + $0x70] sm:$0xff]  ;;  %v413_v6 = vld [vmem:[#allocation5 + $0x28] sm:$0xff]  ;;  %s299_s25 = sshll.u32 %s520_s24, 4  ;;  %s300_s25 = int_to_ptr.vmem [resolvable:$true] %s299_s25 }
   0xd   :  { %v431_v2 = vld [vmem:[#allocation5 + $0xb8] sm:$0xff]  ;;  %267 = vmatpush.bf16.msra.mxu1 %v423_v1  ;;  %v430_v5 = vld [vmem:[#allocation5 + $0xb0] sm:$0xff]  ;;  %v421_v7 = vld [vmem:[#allocation5 + $0x68] sm:$0xff] }
   0xe   :  { %280 = vmatpush.bf16.msra.mxu2 %v431_v2  ;;  %v429_v8 = vld [vmem:[#allocation5 + $0xa8] sm:$0xff]  ;;  %v412_v9 = vld [vmem:[#allocation5 + $0x20] sm:$0xff]  ;;  %v411_v12 = vld [vmem:[#allocation5 + $0x18] sm:$0xff] }
   0xf   :  { %v420_v10 = vld [vmem:[#allocation5 + $0x60] sm:$0xff]  ;;  %v419_v13 = vld [vmem:[#allocation5 + $0x58] sm:$0xff]  ;;  %v410_v15 = vld [vmem:[#allocation5 + $0x10] sm:$0xff] }
  0x10   :  { %255 = vmatpush.bf16.msra.mxu0 %v414_v3  ;;  %v428_v11 = vld [vmem:[#allocation5 + $0xa0] sm:$0xff]  ;;  %v427_v14 = vld [vmem:[#allocation5 + $0x98] sm:$0xff]  ;;  %v418_v16 = vld [vmem:[#allocation5 + $0x50] sm:$0xff] }
  0x11   :  { %268 = vmatpush.bf16.msra.mxu1 %v422_v4  ;;  %v426_v17 = vld [vmem:[#allocation5 + $0x90] sm:$0xff]  ;;  %v409_v18 = vld [vmem:[#allocation5 + $0x8] sm:$0xff]  ;;  %v46_v22 = vld [vmem:[#allocation2 + $0x8] sm:$0xf] }
  0x12   :  { %281 = vmatpush.bf16.msra.mxu2 %v430_v5  ;;  %v417_v19 = vld [vmem:[#allocation5 + $0x48] sm:$0xff]  ;;  %v45_v20 = vld [vmem:[#allocation2] sm:$0xff]  ;;  %v408_v25 = vld [vmem:[#allocation5] sm:$0xff]  ;;  %v103_v27 = vunpack.c.l.b16 %v46_v22 }
  0x13   :  { %v425_v21 = vld [vmem:[#allocation5 + $0x88] sm:$0xff]  ;;  %v101_v23 = vunpack.c.l.b16 %v45_v20  ;;  %v102_v24 = vunpack.c.h.b16 %v45_v20  ;;  %v416_v26 = vld [vmem:[#allocation5 + $0x40] sm:$0xff]  ;;  %v437_v32 = vld [vmem:[%s555_s2] ss:$0 sm:$0xff] }
  0x14   :  { %256 = vmatpush.bf16.msra.mxu0 %v413_v6  ;;  %v424_v28 = vld [vmem:[#allocation5 + $0x80] sm:$0xff]  ;;  %v106_v31 = vpack.c.b16 %v103_v27, %v103_v27 }
  0x15   :  { %269 = vmatpush.bf16.msra.mxu1 %v421_v7  ;;  %v104_v29 = vpack.c.b16 %v101_v23, %v101_v23  ;;  %v105_v30 = vpack.c.b16 %v102_v24, %v102_v24 }
  0x16   :  { %282 = vmatpush.bf16.msra.mxu2 %v429_v8 }
  0x18   :  { %257 = vmatpush.bf16.msra.mxu0 %v412_v9 }
  0x19   :  { %270 = vmatpush.bf16.msra.mxu1 %v420_v10 }
  0x1a   :  { %283 = vmatpush.bf16.msra.mxu2 %v428_v11 }
  0x1c   :  { %258 = vmatpush.bf16.msra.mxu0 %v411_v12 }
  0x1d   :  { %271 = vmatpush.bf16.msra.mxu1 %v419_v13 }
  0x1e   :  { %284 = vmatpush.bf16.msra.mxu2 %v427_v14 }
  0x20   :  { %259 = vmatpush.bf16.msra.mxu0 %v410_v15 }
  0x21   :  { %272 = vmatpush.bf16.msra.mxu1 %v418_v16 }
  0x22   :  { %285 = vmatpush.bf16.msra.mxu2 %v426_v17 }
  0x24   :  { %260 = vmatpush.bf16.msra.mxu0 %v409_v18 }
  0x25   :  { %273 = vmatpush.bf16.msra.mxu1 %v417_v19 }
  0x26   :  { %286 = vmatpush.bf16.msra.mxu2 %v425_v21 }
  0x28   :  { %261 = vmatpush.bf16.msra.mxu0 %v408_v25 }
  0x29   :  { %274 = vmatpush.bf16.msra.mxu1 %v416_v26 }
  0x2a   :  { %287 = vmatpush.bf16.msra.mxu2 %v424_v28 }
  0x2b   :  { %262 = vmatmul.bf16.vlgmr.msra.gmra.mxu0 %v104_v29 }
  0x2c   :  { %275 = vmatmul.bf16.vlgmr.msra.gmra.mxu1 %v105_v30 }
  0x2d   :  { %288 = vmatmul.bf16.vlgmr.msra.gmra.mxu2 %v106_v31 }
  0xa8   :  { %v263_v33 = vpop.f32.mrf.mxu0 }
  0xa9   :  { %v276_v34 = vpop.f32.mrf.mxu1  ;;  %v264_v35 = vadd.f32 %v437_v32, %v263_v33 }
  0xab   :  { %v277_v36 = vadd.f32 %v276_v34, %v264_v35 }
  0xb0   :  { %v289_v37 = vpop.f32.mrf.mxu2  ;;  %v265_v39 = vpop.f32.mrf.mxu0 }
  0xb1   :  { %v290_v38 = vadd.f32 %v289_v37, %v277_v36  ;;  %v278_v40 = vpop.f32.mrf.mxu1 }
  0xb3   :  { %293 = vst [vmem:[#allocation7] sm:$0xff] %v290_v38 }
  0xb4   :  { %304 = dma.vmem_to_hbm [thread:$0]  %s300_s25, 128, %s302_s28, [#allocation4]  }
  0xb8   :  { %v291_v41 = vpop.f32.mrf.mxu2 }
  0xb9   :  { %514 = dma.done.wait [#allocation4], 128  }
  0xba   :  { %515 = vsyncadd [#allocation4], 4294967168 }
  0xbb   :  { %309 = vsyncpa [#allocation3], 1 }
  0xbc   :  { %310 = vsyncpa [#allocation6], 1 }
  0xbd   :  { %311 = vsyncpa [#allocation4], 1 }

</bundles_post_ra>
